<compile_context>
chip_gen: v7x
topology: tpu7x:2x2x1
jax: 0.10.0
libtpu: 0.0.40
codegen_flags: <defaults>
</compile_context>

<pallas_src>
import numpy as np
import jax
import jax.numpy as jnp
from jax import lax
from jax.experimental import pallas as pl
from jax.experimental.pallas import tpu as pltpu


# ----------------------------------------------------------------------------
# Kernels
# ----------------------------------------------------------------------------
def _make_kernel(batched_dot: bool, has_bias: bool):
    def kernel(*refs):
        if has_bias:
            x_ref, w_ref, b_ref, o_ref = refs
        else:
            x_ref, w_ref, o_ref = refs
        x = x_ref[...]                      # (tb, tn, d_in)
        w = w_ref[...]                      # (tn, d_in, td_out)
        if batched_dot:
            # Contract directly on the native (tb, tn, d_in) layout: the layer
            # axis is the batch dim (x axis 1 <-> w axis 0).  No input-side
            # relayout; the result is already (tn, tb, td_out).
            y = lax.dot_general(
                x, w,
                dimension_numbers=(((2,), (1,)), ((1,), (0,))),
                preferred_element_type=jnp.float32)
        else:
            # Fallback (known-good lowering): explicit relayout to
            # (tn, tb, d_in) followed by a leading-batch contraction.
            y = lax.dot_general(
                jnp.swapaxes(x, 0, 1), w,
                dimension_numbers=(((2,), (1,)), ((0,), (0,))),
                preferred_element_type=jnp.float32)
        if has_bias:
            y = y + b_ref[...].astype(jnp.float32)[:, None, :]
        # Single remaining relayout: (tn, tb, td_out) -> (tb, tn, td_out).
        # Kept in-kernel (VMEM) rather than as an extra HBM pass on the output.
        o_ref[...] = jnp.swapaxes(y, 0, 1).astype(o_ref.dtype)
    return kernel


# ----------------------------------------------------------------------------
# Generation-aware budgets / tile selection
# ----------------------------------------------------------------------------
def _vmem_capacity_bytes() -> int:
    try:
        info = pltpu.get_tpu_info()
        cap = int(getattr(info, "vmem_capacity_bytes", 0) or 0)
        if cap > 0:
            return cap
    except Exception:
        pass
    return 64 << 20  # conservative (v7x-sized) default


def _vmem_budget(max_weight_block_bytes=None, max_io_block_bytes=None):
    phys = _vmem_capacity_bytes()
    if phys >= (100 << 20):          # v5e / v6e: 128 MiB physical VMEM
        w_cap, io_cap, soft_ceiling = 12 << 20, 12 << 20, 96 << 20
    else:                            # v7x (64 MiB physical) or unknown
        w_cap, io_cap, soft_ceiling = 4 << 20, 4 << 20, 40 << 20
    if max_weight_block_bytes is not None:
        w_cap = int(max_weight_block_bytes)
    if max_io_block_bytes is not None:
        io_cap = int(max_io_block_bytes)
    return phys, w_cap, io_cap, soft_ceiling


def _pick_tiles(B, N, d_in, d_out, itemsize, w_cap, io_cap):
    """Pick (tb, tn, td_out) block sizes.

    tn is the second-to-last dim of the x / out blocks, so it must be a
    multiple of the dtype's sublane packing (8 for 32-bit, 16 for 16-bit,
    32 for 8-bit) or equal the full N.  td_out is the lane dim of the weight /
    out blocks (multiple of 128 or full).  tb is a leading block dim (no
    alignment constraint).
    """
    gran = 8 if itemsize >= 4 else (16 if itemsize == 2 else 32)
    if N < gran:
        tn = N
    else:
        tn = min((N // gran) * gran, 64)
        while tn > gran and tn * d_in * d_out * itemsize > w_cap:
            tn -= gran
    # If a per-layer weight slab is still too big, tile d_out (128-lane blocks).
    td_out = d_out
    if tn * d_in * td_out * itemsize > w_cap and d_out > 128:
        budget = w_cap // max(1, tn * d_in * itemsize)
        td_out = max(128, min(256, (budget // 128) * 128))
    # TODO(synk): very large d_in would additionally need a d_in reduction grid
    # axis with an f32 VMEM accumulator (pl.when init/finalize); not implemented.
    tb = min(B, 2048)
    while tb > 8 and tb * tn * (d_in + td_out) * itemsize > io_cap:
        tb = max(8, tb // 2)
    return tb, tn, td_out


# ----------------------------------------------------------------------------
# Wrapper
# ----------------------------------------------------------------------------
_BATCHED_DOT_OK = None  # cached: does the batched (non-leading-batch) dot lower?


def nlinear_pallas(x, weight, bias=None, *,
                   max_weight_block_bytes=None, max_io_block_bytes=None):
    """Apply N separate linear layers (NLinear.forward) with a Pallas TPU kernel.

    x:      (*batch, *n, in_features)
    weight: (*n, in_features, out_features)
    bias:   (*n, out_features) or None
    returns (*batch, *n, out_features)
    """
    global _BATCHED_DOT_OK

    n_shape = weight.shape[:-2]
    d_in, d_out = int(weight.shape[-2]), int(weight.shape[-1])
    n_ndim = len(n_shape)

    if x.ndim < weight.ndim - 1:
        raise ValueError(f"The input must have at least {weight.ndim - 1} dims, got {x.ndim}")
    if x.shape[-1] != d_in:
        raise ValueError(f"x.shape[-1]={x.shape[-1]} != in_features={d_in}")
    if x.shape[-(n_ndim + 1):] != weight.shape[:-1]:
        raise ValueError(f"x.shape={x.shape} incompatible with n={n_shape}, in_features={d_in}")

    batch_shape = x.shape[: x.ndim - n_ndim - 1]
    N = int(np.prod(n_shape))
    B = int(np.prod(batch_shape)) if batch_shape else 1

    # Layout-preserving collapses only (free); no HBM transposes of x / out.
    x2 = x.reshape(B, N, d_in)                    # (B, N, d_in)
    w2 = weight.reshape(N, d_in, d_out)           # (N, d_in, d_out)
    b2 = None if bias is None else bias.reshape(N, d_out)

    itemsize = jnp.dtype(x.dtype).itemsize
    phys, w_cap, io_cap, soft_ceiling = _vmem_budget(max_weight_block_bytes,
                                                     max_io_block_bytes)
    tb, tn, td_out = _pick_tiles(B, N, d_in, d_out, itemsize, w_cap, io_cap)

    n_tiles = pl.cdiv(N, tn)
    o_tiles = pl.cdiv(d_out, td_out)
    b_tiles = pl.cdiv(B, tb)
    # b is the innermost grid axis and the weight / bias index_maps ignore it,
    # so a weight tile stays resident in VMEM across all batch tiles.
    grid = (n_tiles, o_tiles, b_tiles)

    in_specs = [
        pl.BlockSpec((tb, tn, d_in), lambda n, o, b: (b, n, 0)),        # x tile
        pl.BlockSpec((tn, d_in, td_out), lambda n, o, b: (n, 0, o)),    # weight tile
    ]
    args = [x2, w2]
    if b2 is not None:
        in_specs.append(pl.BlockSpec((tn, td_out), lambda n, o, b: (n, o)))
        args.append(b2)
    out_spec = pl.BlockSpec((tb, tn, td_out), lambda n, o, b: (b, n, o))

    # VMEM budget: double-buffered blocks + in-kernel f32 temporaries + margin.
    blk_in = itemsize * (tb * tn * d_in + tn * d_in * td_out
                         + (tn * td_out if b2 is not None else 0))
    blk_out = itemsize * tb * tn * td_out
    temps = 3 * 4 * tb * tn * td_out       # f32 matmul result + relayout copy + slack
    need = 2 * (blk_in + blk_out) + temps + (4 << 20)
    vmem_limit = int(max(32 << 20, min(need, soft_ceiling)))
    if need > soft_ceiling:
        vmem_limit = int(min(need, phys - (8 << 20)))

    # Force megacore sharding onto the n axis (disjoint weight sets per core)
    # whenever it has >= 2 tiles; otherwise let the compiler shard freely.
    if n_tiles >= 2:
        dim_sem = ("parallel", "arbitrary", "arbitrary")
    else:
        dim_sem = ("parallel", "parallel", "parallel")

    cost = pl.CostEstimate(
        flops=2 * B * N * d_in * d_out,
        transcendentals=0,
        bytes_accessed=itemsize * (B * N * d_in + N * d_in * d_out + B * N * d_out
                                   + (N * d_out if b2 is not None else 0)))

    def build(batched_dot):
        kernel = _make_kernel(batched_dot, b2 is not None)
        return pl.pallas_call(
            kernel,
            out_shape=jax.ShapeDtypeStruct((B, N, d_out), x.dtype),
            grid=grid,
            in_specs=in_specs,
            out_specs=out_spec,
            compiler_params=pltpu.CompilerParams(
                dimension_semantics=dim_sem,
                vmem_limit_bytes=vmem_limit),
            cost_estimate=cost,
        )

    if _BATCHED_DOT_OK is False:
        out = build(False)(*args)
    else:
        try:
            out = build(True)(*args)
            _BATCHED_DOT_OK = True
        except Exception:
            # Batched dimension-numbers did not lower on this backend; use the
            # known-good leading-batch kernel (one extra in-kernel relayout).
            _BATCHED_DOT_OK = False
            out = build(False)(*args)

    return out.reshape(*batch_shape, *n_shape, d_out)


def init_nlinear_params(key, n, in_features, out_features, bias=True, dtype=jnp.float32):
    """Deterministic init matching NLinear.reset_parameters: U(-d_in^-0.5, d_in^-0.5)."""
    n_tuple = (n,) if isinstance(n, int) else tuple(n)
    bound = in_features ** (-0.5)
    k_w, k_b = jax.random.split(key)
    weight = jax.random.uniform(
        k_w, (*n_tuple, in_features, out_features), dtype=dtype, minval=-bound, maxval=bound)
    b = None
    if bias:
        b = jax.random.uniform(
            k_b, (*n_tuple, out_features), dtype=dtype, minval=-bound, maxval=bound)
    return weight, b


if __name__ == "__main__":
    key = jax.random.PRNGKey(0)
    k_x, k_p, k_x2, k_p2, k_x3, k_p3, k_x5, k_p5 = jax.random.split(key, 8)

    # 1) NLP-style: batch=2, sequence N=8, d_in=32, d_out=16, with bias.
    batch_size, seq_len, d_in, d_out = 2, 8, 32, 16
    x = jax.random.normal(k_x, (batch_size, seq_len, d_in), dtype=jnp.float32)
    weight, bias = init_nlinear_params(k_p, seq_len, d_in, d_out, bias=True)
    y = nlinear_pallas(x, weight, bias)
    jax.block_until_ready(y)
    y_ref = jnp.einsum("bnd,nde->bne", x, weight) + bias
    assert y.shape == (batch_size, seq_len, d_out), y.shape
    np.testing.assert_allclose(np.asarray(y), np.asarray(y_ref), rtol=1e-4, atol=1e-4)

    # 2) Same shapes, bias=None (exercises the bias-free kernel variant).
    y_nb = nlinear_pallas(x, weight, None)
    jax.block_until_ready(y_nb)
    np.testing.assert_allclose(
        np.asarray(y_nb), np.asarray(jnp.einsum("bnd,nde->bne", x, weight)),
        rtol=1e-4, atol=1e-4)

    # 3) Larger case exercising a multi-tile n grid (N=128 -> two n-tiles of 64)
    #    with a lane-dense (d_out=128) output and forced n-axis core sharding.
    B2, N2, di2, do2 = 16, 128, 64, 128
    x2 = jax.random.normal(k_x2, (B2, N2, di2), dtype=jnp.float32)
    w2, b2 = init_nlinear_params(k_p2, N2, di2, do2, bias=True)
    y2 = nlinear_pallas(x2, w2, b2)
    jax.block_until_ready(y2)
    y2_ref = jnp.einsum("bnd,nde->bne", x2, w2) + b2
    np.testing.assert_allclose(np.asarray(y2), np.asarray(y2_ref), rtol=1e-4, atol=1e-4)

    # 4) CV-style: multi-dim n=(4, 4), channels 8 -> 8 (wrapper flattens n dims).
    B3, W3, H3, ci, co = 2, 4, 4, 8, 8
    x3 = jax.random.normal(k_x3, (B3, W3, H3, ci), dtype=jnp.float32)
    w3, b3 = init_nlinear_params(k_p3, (W3, H3), ci, co, bias=True)
    y3 = nlinear_pallas(x3, w3, b3)
    jax.block_until_ready(y3)
    y3_ref = jnp.einsum("bwhd,whde->bwhe", x3, w3) + b3
    assert y3.shape == (B3, W3, H3, co), y3.shape
    np.testing.assert_allclose(np.asarray(y3), np.asarray(y3_ref), rtol=1e-4, atol=1e-4)

    # 5) d_out-tiling path: a tiny forced weight-block cap makes the wrapper tile
    #    d_out=384 into three 128-wide lane blocks (multi-tile 3-D grid).
    B5, N5, di5, do5 = 8, 16, 32, 384
    x5 = jax.random.normal(k_x5, (B5, N5, di5), dtype=jnp.float32)
    w5, b5 = init_nlinear_params(k_p5, N5, di5, do5, bias=True)
    y5 = nlinear_pallas(x5, w5, b5, max_weight_block_bytes=128 << 10)
    jax.block_until_ready(y5)
    y5_ref = jnp.einsum("bnd,nde->bne", x5, w5) + b5
    np.testing.assert_allclose(np.asarray(y5), np.asarray(y5_ref), rtol=1e-4, atol=1e-4)

    print("KERNEL_OK")
</pallas_src>

<mosaic_0001>
module attributes {stable_mosaic.version = 11 : i64} {
  func.func @kernel(%arg0: i32, %arg1: i32, %arg2: i32, %arg3: memref<2x8x32xf32, #tpu.memory_space<vmem>>, %arg4: memref<8x32x16xf32, #tpu.memory_space<vmem>>, %arg5: memref<8x16xf32, #tpu.memory_space<vmem>>, %arg6: memref<2x8x16xf32, #tpu.memory_space<vmem>>) attributes {dimension_semantics = [#tpu.dimension_semantics<parallel>, #tpu.dimension_semantics<parallel>, #tpu.dimension_semantics<parallel>], iteration_bounds = array<i64: 1, 1, 1>, scalar_prefetch = 0 : i64, scratch_operands = 0 : i64, tpu.core_type = #tpu.core_type<tc>, window_params = [{transform_indices = @transform_0, window_bounds = array<i64: 2, 8, 32>}, {transform_indices = @transform_1, window_bounds = array<i64: 8, 32, 16>}, {transform_indices = @transform_2, window_bounds = array<i64: 8, 16>}, {transform_indices = @transform_3, window_bounds = array<i64: 2, 8, 16>}]} {
    %c0 = arith.constant 0 : index
    %c0_0 = arith.constant 0 : index
    %c0_1 = arith.constant 0 : index
    %0 = vector.load %arg3[%c0, %c0_0, %c0_1] : memref<2x8x32xf32, #tpu.memory_space<vmem>>, vector<2x8x32xf32>
    %c0_2 = arith.constant 0 : index
    %c0_3 = arith.constant 0 : index
    %c0_4 = arith.constant 0 : index
    %1 = vector.load %arg4[%c0_2, %c0_3, %c0_4] : memref<8x32x16xf32, #tpu.memory_space<vmem>>, vector<8x32x16xf32>
    %cst = arith.constant dense<0.000000e+00> : vector<8x2x16xf32>
    %2 = tpu.matmul %0, %1, %cst {dimension_numbers = #tpu.dot_dimension_numbers<[2], [1], [0], [2], [0, 1, 0, 0, 1, 2], [1], [0]>} : vector<2x8x32xf32>, vector<8x32x16xf32>, vector<8x2x16xf32> -> vector<8x2x16xf32>
    %c0_5 = arith.constant 0 : index
    %c0_6 = arith.constant 0 : index
    %3 = vector.load %arg5[%c0_5, %c0_6] : memref<8x16xf32, #tpu.memory_space<vmem>>, vector<8x16xf32>
    %4 = vector.shape_cast %3 : vector<8x16xf32> to vector<8x1x16xf32>
    %5 = vector.broadcast %4 : vector<8x1x16xf32> to vector<8x2x16xf32>
    %6 = arith.addf %2, %5 : vector<8x2x16xf32>
    %7 = tpu.transpose %6, [1, 0, 2] : vector<8x2x16xf32> -> vector<2x8x16xf32>
    %c0_7 = arith.constant 0 : index
    %c0_8 = arith.constant 0 : index
    %c0_9 = arith.constant 0 : index
    %8 = vector.load %arg6[%c0_7, %c0_8, %c0_9] : memref<2x8x16xf32, #tpu.memory_space<vmem>>, vector<2x8x16xf32>
    tpu.vector_store %arg6[%c0_7, %c0_8, %c0_9], %7 {strides = array<i32>} : memref<2x8x16xf32, #tpu.memory_space<vmem>>, vector<2x8x16xf32>,
    return
  }
  func.func @transform_0(%arg0: i32, %arg1: i32, %arg2: i32) -> (i32, i32, i32) {
    %c0_i32 = arith.constant 0 : i32
    %c0_i32_0 = arith.constant 0 : i32
    return %arg2, %arg0, %c0_i32 : i32, i32, i32
  }
  func.func @transform_1(%arg0: i32, %arg1: i32, %arg2: i32) -> (i32, i32, i32) {
    %c0_i32 = arith.constant 0 : i32
    %c0_i32_0 = arith.constant 0 : i32
    return %arg0, %c0_i32, %arg1 : i32, i32, i32
  }
  func.func @transform_2(%arg0: i32, %arg1: i32, %arg2: i32) -> (i32, i32) {
    %c0_i32 = arith.constant 0 : i32
    return %arg0, %arg1 : i32, i32
  }
  func.func @transform_3(%arg0: i32, %arg1: i32, %arg2: i32) -> (i32, i32, i32) {
    %c0_i32 = arith.constant 0 : i32
    return %arg2, %arg0, %arg1 : i32, i32, i32
  }
}

module attributes {stable_mosaic.version = 11 : i64} {
  func.func @kernel(%arg0: i32, %arg1: i32, %arg2: i32, %arg3: memref<2x8x32xf32, #tpu.memory_space<vmem>>, %arg4: memref<8x32x16xf32, #tpu.memory_space<vmem>>, %arg5: memref<8x16xf32, #tpu.memory_space<vmem>>, %arg6: memref<2x8x16xf32, #tpu.memory_space<vmem>>) attributes {dimension_semantics = [#tpu.dimension_semantics<parallel>, #tpu.dimension_semantics<parallel>, #tpu.dimension_semantics<parallel>], iteration_bounds = array<i64: 1, 1, 1>, scalar_prefetch = 0 : i64, scratch_operands = 0 : i64, tpu.core_type = #tpu.core_type<tc>, window_params = [{transform_indices = @transform_0, window_bounds = array<i64: 2, 8, 32>}, {transform_indices = @transform_1, window_bounds = array<i64: 8, 32, 16>}, {transform_indices = @transform_2, window_bounds = array<i64: 8, 16>}, {transform_indices = @transform_3, window_bounds = array<i64: 2, 8, 16>}]} {
    %c0 = arith.constant 0 : index
    %c0_0 = arith.constant 0 : index
    %c0_1 = arith.constant 0 : index
    %0 = vector.load %arg3[%c0, %c0_0, %c0_1] : memref<2x8x32xf32, #tpu.memory_space<vmem>>, vector<2x8x32xf32>
    %c0_2 = arith.constant 0 : index
    %c0_3 = arith.constant 0 : index
    %c0_4 = arith.constant 0 : index
    %1 = vector.load %arg4[%c0_2, %c0_3, %c0_4] : memref<8x32x16xf32, #tpu.memory_space<vmem>>, vector<8x32x16xf32>
    %2 = tpu.transpose %0, [1, 0, 2] : vector<2x8x32xf32> -> vector<8x2x32xf32>
    %cst = arith.constant dense<0.000000e+00> : vector<8x2x16xf32>
    %3 = tpu.matmul %2, %1, %cst {dimension_numbers = #tpu.dot_dimension_numbers<[2], [1], [1], [2], [0, 0, 0, 1, 1, 2], [0], [0]>} : vector<8x2x32xf32>, vector<8x32x16xf32>, vector<8x2x16xf32> -> vector<8x2x16xf32>
    %c0_5 = arith.constant 0 : index
    %c0_6 = arith.constant 0 : index
    %4 = vector.load %arg5[%c0_5, %c0_6] : memref<8x16xf32, #tpu.memory_space<vmem>>, vector<8x16xf32>
    %5 = vector.shape_cast %4 : vector<8x16xf32> to vector<8x1x16xf32>
    %6 = vector.broadcast %5 : vector<8x1x16xf32> to vector<8x2x16xf32>
    %7 = arith.addf %3, %6 : vector<8x2x16xf32>
    %8 = tpu.transpose %7, [1, 0, 2] : vector<8x2x16xf32> -> vector<2x8x16xf32>
    %c0_7 = arith.constant 0 : index
    %c0_8 = arith.constant 0 : index
    %c0_9 = arith.constant 0 : index
    %9 = vector.load %arg6[%c0_7, %c0_8, %c0_9] : memref<2x8x16xf32, #tpu.memory_space<vmem>>, vector<2x8x16xf32>
    tpu.vector_store %arg6[%c0_7, %c0_8, %c0_9], %8 {strides = array<i32>} : memref<2x8x16xf32, #tpu.memory_space<vmem>>, vector<2x8x16xf32>,
    return
  }
  func.func @transform_0(%arg0: i32, %arg1: i32, %arg2: i32) -> (i32, i32, i32) {
    %c0_i32 = arith.constant 0 : i32
    %c0_i32_0 = arith.constant 0 : i32
    return %arg2, %arg0, %c0_i32 : i32, i32, i32
  }
  func.func @transform_1(%arg0: i32, %arg1: i32, %arg2: i32) -> (i32, i32, i32) {
    %c0_i32 = arith.constant 0 : i32
    %c0_i32_0 = arith.constant 0 : i32
    return %arg0, %c0_i32, %arg1 : i32, i32, i32
  }
  func.func @transform_2(%arg0: i32, %arg1: i32, %arg2: i32) -> (i32, i32) {
    %c0_i32 = arith.constant 0 : i32
    return %arg0, %arg1 : i32, i32
  }
  func.func @transform_3(%arg0: i32, %arg1: i32, %arg2: i32) -> (i32, i32, i32) {
    %c0_i32 = arith.constant 0 : i32
    return %arg2, %arg0, %arg1 : i32, i32, i32
  }
}

</mosaic_0001>

<bundles_post_ra>
// kernel: tpu_custom_call.1
= control target key start
LH: loop header
LB: loop body
LE: loop exit
PB: predicated region body
PF: predicated region fallthrough
CT: control target
= control target key end

     0   :  { %v55_v3 = vlaneseq  ;;  %v1078_v4 = vmov 0.0|0.0   ;;  %vm1079_vm0 = vmmov 0   ;;  %v1080_v12 = vmov 0.0   ;;  %s1294_s0 = inlined_call_operand.vmem [shape: f32[2,8,32], index: 0, kind: input, shape index: {}]   ;;  %s1295_s1 = inlined_call_operand.vmem [shape: f32[8,32,16], index: 1, kind: input, shape index: {}]   ;;  %s1296_s2 = inlined_call_operand.vmem [shape: f32[8,16], index: 2, kind: input, shape index: {}]   ;;  %s1297_s3 = inlined_call_operand.hbm [shape: f32[2,8,16], index: 3, kind: output, shape index: {}]  }
   0x1   :  { %v17_v0 = vld [vmem:[%s1295_s1] sm:$0xff]  ;;  %v18_v1 = vld [vmem:[%s1295_s1 + $0x8] sm:$0xff]  ;;  %996 = vmatprep.subr.bf16.mxu0 %v1078_v4  ;;  %1002 = vmatprep.subr.bf16.mxu1 %v1078_v4  ;;  %v19_v7 = vld [vmem:[%s1295_s1 + $0x10] sm:$0xff]  ;;  %v1081_v14 = vmov 1983009808   ;;  %vm206_vm1 = vcmask 261120  }
   0x2   :  { %v21_v2 = vld [vmem:[%s1295_s1 + $0x20] sm:$0xff]  ;;  %v997_v5 = vpack.c.bf16 %v18_v1, %v17_v0  ;;  %v22_v6 = vld [vmem:[%s1295_s1 + $0x28] sm:$0xff]  ;;  %v20_v8 = vld [vmem:[%s1295_s1 + $0x18] sm:$0xff]  ;;  %916 = vmatprep.mubr.msk.f32.mxu0 %vm1079_vm0, %v1080_v12  ;;  %v1135_v13 = vshrl.u32 %v55_v3, 7  ;;  %v142_v15 = vunpack.c.l.s4 %v1081_v14  ;;  %927 = vmatprep.mubr.msk.f32.mxu1 %vm1079_vm0, %v1080_v12  ;;  %v1082_v19 = vmov 1934713408  }
   0x3   :  { %v1003_v9 = vpack.c.bf16 %v22_v6, %v21_v2  ;;  %v23_v10 = vld [vmem:[%s1295_s1 + $0x30] sm:$0xff]  ;;  %v24_v11 = vld [vmem:[%s1295_s1 + $0x38] sm:$0xff]  ;;  %v1000_v16 = vpack.c.bf16 %v20_v8, %v19_v7  ;;  %v173_v20 = vunpack.c.l.s4 %v1082_v19  ;;  %v15_v21 = vld [vmem:[%s1294_s0] sm:$0xff] }
   0x4   :  { %998 = vmatpush3.bf16.msra.mxu0 %v997_v5  ;;  %v1006_v17 = vpack.c.bf16 %v24_v11, %v23_v10  ;;  %v143_v18 = vunpack.c.0.s8 %v142_v15  ;;  %v16_v22 = vld [vmem:[%s1294_s0 + $0x8] sm:$0xff]  ;;  %v25_v27 = vld [vmem:[%s1295_s1 + $0x40] sm:$0xff] }
   0x5   :  { %1004 = vmatpush3.bf16.msra.mxu1 %v1003_v9  ;;  %999 = vmatprep.subr.bf16.mxu0 %v1078_v4  ;;  %v174_v24 = vunpack.c.0.s8 %v173_v20  ;;  %v26_v28 = vld [vmem:[%s1295_s1 + $0x48] sm:$0xff]  ;;  %v29_v31 = vld [vmem:[%s1295_s1 + $0x60] sm:$0xff] }
   0x6   :  { %1005 = vmatprep.subr.bf16.mxu1 %v1078_v4  ;;  %v1148_v23 = vsub.s32 %v143_v18, %v1135_v13  ;;  %v30_v32 = vld [vmem:[%s1295_s1 + $0x68] sm:$0xff]  ;;  %v1009_v33 = vpack.c.bf16 %v26_v28, %v25_v27 }
   0x7   :  { %v1160_v29 = vsub.s32 %v174_v24, %v1135_v13 }
   0x8   :  { %1001 = vmatpush3.bf16.msra.mxu0 %v1000_v16  ;;  %v147_v25 = vrot.slane %v15_v21, %v1148_v23  ;;  %v162_v26 = vrot.slane %v16_v22, %v1148_v23 }
   0x9   :  { %1007 = vmatpush3.bf16.msra.mxu1 %v1006_v17  ;;  %1008 = vmatprep.subr.bf16.mxu0 %v1078_v4 }
   0xa   :  { %1014 = vmatprep.subr.bf16.mxu1 %v1078_v4  ;;  %v170_v30 = vcombine.low %v147_v25, %v162_v26 }
   0xb   :  { %8 = vsyncpa [#allocation3], 0  ;;  %v140_v34 = vcombine.high %v15_v21, %v1080_v12  ;;  %v155_v35 = vcombine.high %v16_v22, %v1080_v12  ;;  %v171_v36 = vcombine.high %v147_v25, %v162_v26  ;;  %v27_v38 = vld [vmem:[%s1295_s1 + $0x50] sm:$0xff]  ;;  %v28_v39 = vld [vmem:[%s1295_s1 + $0x58] sm:$0xff]  ;;  %v1015_v40 = vpack.c.bf16 %v30_v32, %v29_v31 }
   0xc   :  { %v178_v37 = vrot.slane %v170_v30, %v1160_v29  ;;  %v31_v42 = vld [vmem:[%s1295_s1 + $0x70] sm:$0xff]  ;;  %v32_v43 = vld [vmem:[%s1295_s1 + $0x78] sm:$0xff]  ;;  %v1012_v44 = vpack.c.bf16 %v28_v39, %v27_v38  ;;  %v33_v48 = vld [vmem:[%s1295_s1 + $0x80] sm:$0xff]  ;;  %v1083_v19 = vmov 1966171168   ;;  %v102_v27 = vsub.s32 0, %v1135_v13 }
   0xd   :  { %v154_v45 = vrot.slane %v140_v34, %v1148_v23  ;;  %v169_v46 = vrot.slane %v155_v35, %v1148_v23  ;;  %v185_v47 = vrot.slane %v171_v36, %v1160_v29  ;;  %v34_v49 = vld [vmem:[%s1295_s1 + $0x88] sm:$0xff]  ;;  %v1018_v50 = vpack.c.bf16 %v32_v43, %v31_v42  ;;  %v37_v51 = vld [vmem:[%s1295_s1 + $0xa0] sm:$0xff]  ;;  %v35_v55 = vld [vmem:[%s1295_s1 + $0x90] sm:$0xff] }
   0xe   :  { %917 = vmatmul.mubr.msk.f32.vlgmr.msra.gmra.mrb[0].mxu0 %vm206_vm1, %v178_v37  ;;  %v202_v41 = vcombine.high %v178_v37, %v1080_v12  ;;  %v38_v52 = vld [vmem:[%s1295_s1 + $0xa8] sm:$0xff]  ;;  %v1021_v53 = vpack.c.bf16 %v34_v49, %v33_v48  ;;  %v36_v56 = vld [vmem:[%s1295_s1 + $0x98] sm:$0xff]  ;;  %v39_v59 = vld [vmem:[%s1295_s1 + $0xb0] sm:$0xff]  ;;  %v53_v20 = vunpack.c.l.s4 %v1083_v19  ;;  %vm841_vm2 = vcmask 130048  }
   0xf   :  { %1010 = vmatpush3.bf16.msra.mxu0 %v1009_v33  ;;  %938 = vmatprep.mubr.msk.f32.mxu0 %vm1079_vm0, %v1080_v12  ;;  %v203_v54 = vcombine.high %v185_v47, %v1080_v12  ;;  %v186_v57 = vcombine.low %v154_v45, %v169_v46  ;;  %v1027_v58 = vpack.c.bf16 %v38_v52, %v37_v51  ;;  %v40_v60 = vld [vmem:[%s1295_s1 + $0xb8] sm:$0xff]  ;;  %v41_v63 = vld [vmem:[%s1295_s1 + $0xc0] sm:$0xff]  ;;  %v42_v0 = vld [vmem:[%s1295_s1 + $0xc8] sm:$0xff] }
  0x10   :  { %928 = vmatmul.mubr.msk.f32.vlgmr.msra.gmra.mrb[0].mxu1 %vm206_vm1, %v202_v41  ;;  %1011 = vmatprep.subr.bf16.mxu0 %v1078_v4  ;;  %v1024_v61 = vpack.c.bf16 %v36_v56, %v35_v55  ;;  %v1030_v1 = vpack.c.bf16 %v40_v60, %v39_v59  ;;  %v45_v2 = vld [vmem:[%s1295_s1 + $0xe0] sm:$0xff]  ;;  %v46_v3 = vld [vmem:[%s1295_s1 + $0xe8] sm:$0xff]  ;;  %v1033_v5 = vpack.c.bf16 %v42_v0, %v41_v63  ;;  %v43_v7 = vld [vmem:[%s1295_s1 + $0xd0] sm:$0xff]  ;;  %v54_v21 = vunpack.c.0.s8 %v53_v20 }
  0x11   :  { %1016 = vmatpush3.bf16.msra.mxu1 %v1015_v40  ;;  %949 = vmatprep.mubr.msk.f32.mxu1 %vm1079_vm0, %v1080_v12  ;;  %v194_v62 = vrot.slane %v186_v57, %v1160_v29  ;;  %v44_v8 = vld [vmem:[%s1295_s1 + $0xd8] sm:$0xff]  ;;  %v187_v9 = vcombine.high %v154_v45, %v169_v46  ;;  %v1039_v10 = vpack.c.bf16 %v46_v3, %v45_v2  ;;  %v47_v11 = vld [vmem:[%s1295_s1 + $0xf0] sm:$0xff]  ;;  %v49_v24 = vld [vmem:[%s1296_s2] sm:$0xff]  ;;  %s1084_s2 = smov [#allocation2]  }
  0x12   :  { %1017 = vmatprep.subr.bf16.mxu1 %v1078_v4  ;;  %v48_v14 = vld [vmem:[%s1295_s1 + $0xf8] sm:$0xff]  ;;  %v1036_v15 = vpack.c.bf16 %v44_v8, %v43_v7  ;;  %v57_v22 = vsub.s32 %v54_v21, %v1135_v13  ;;  %v51_v31 = vcombine.high %v49_v24, %v49_v24  ;;  %s849_s25 = sshll.u32 %s1084_s2, 4  ;;  %s850_s25 = int_to_ptr.vmem [resolvable:$true] %s849_s25 }
  0x13   :  { %1013 = vmatpush3.bf16.msra.mxu0 %v1012_v44  ;;  %v204_v6 = vcombine.high %v194_v62, %v1080_v12  ;;  %v201_v16 = vrot.slane %v187_v9, %v1160_v29  ;;  %v1042_v17 = vpack.c.bf16 %v48_v14, %v47_v11  ;;  %s1054_s26 = scalar_lea.vmem %s850_s25, 256  ;;  %p1059_p1 = scmp.lt.s32.totalorder %s850_s25, %s850_s25 }
  0x14   :  { %1020 = vmatprep.subr.bf16.mxu0 %v1078_v4  ;;  %v58_v25 = vrot.slane %v49_v24, %v57_v22  ;;  %v65_v40 = vrot.slane %v51_v31, %v57_v22  ;;  %p1055_p0 = scmp.ne.s32.totalorder %s850_s25, %s1054_s26  ;;  %p1060_p2 = scmp.lt.s32.totalorder %s1054_s26, %s1054_s26 }
  0x15   :  { %1019 = vmatpush3.bf16.msra.mxu1 %v1018_v50  ;;  %v205_v18 = vcombine.high %v201_v16, %v1080_v12 }
  0x16   :  { %939 = vmatmul.mubr.msk.f32.vlgmr.msra.gmra.mrb[2].mxu0 %vm206_vm1, %v185_v47  ;;  %1026 = vmatprep.subr.bf16.mxu1 %v1078_v4  ;;  %v66_v26 = vcombine.high %v58_v25, %v58_v25  ;;  %v67_v43 = vcombine.high %v65_v40, %v65_v40  ;;  %v81_v13 = vrot.slane %v65_v40, %v57_v22  ;;  %p1061_p3 = por %p1060_p2, %p1059_p1 }
  0x17   :  { %1022 = vmatpush3.bf16.msra.mxu0 %v1021_v53  ;;  %960 = vmatprep.mubr.msk.f32.mxu0 %vm1079_vm0, %v1080_v12 }
  0x18   :  { %950 = vmatmul.mubr.msk.f32.vlgmr.msra.gmra.mrb[2].mxu1 %vm206_vm1, %v203_v54  ;;  %1023 = vmatprep.subr.bf16.mxu0 %v1078_v4  ;;  %v95_v51 = vrot.slane %v67_v43, %v57_v22  ;;  %v119_v53 = vrot.slane %v81_v13, %v102_v27  ;;  %p1062_p4 = pnand %p1061_p3, %p1055_p0 }
  0x19   :  { %1028 = vmatpush3.bf16.msra.mxu1 %v1027_v58  ;;  %971 = vmatprep.mubr.msk.f32.mxu1 %vm1079_vm0, %v1080_v12 }
  0x1a   :  { %1029 = vmatprep.subr.bf16.mxu1 %v1078_v4  ;;  %v123_v56 = vrot.slane %v95_v51, %v102_v27 }
  0x1b   :  { %1025 = vmatpush3.bf16.msra.mxu0 %v1024_v61  ;;  %v97_v61 = vcombine.high %v81_v13, %v81_v13 }
  0x1c   :  { %1032 = vmatprep.subr.bf16.mxu0 %v1078_v4 }
  0x1d   :  { %1031 = vmatpush3.bf16.msra.mxu1 %v1030_v1  ;;  %v99_v1 = vcombine.high %v95_v51, %v95_v51  ;;  %v127_v2 = vrot.slane %v97_v61, %v102_v27 }
  0x1e   :  { %961 = vmatmul.mubr.msk.f32.vlgmr.msra.gmra.mrb[4].mxu0 %vm206_vm1, %v194_v62  ;;  %1038 = vmatprep.subr.bf16.mxu1 %v1078_v4 }
  0x1f   :  { %1034 = vmatpush3.bf16.msra.mxu0 %v1033_v5  ;;  %982 = vmatprep.mubr.msk.f32.mxu0 %vm1079_vm0, %v1080_v12  ;;  %v131_v3 = vrot.slane %v99_v1, %v102_v27 }
  0x20   :  { %972 = vmatmul.mubr.msk.f32.vlgmr.msra.gmra.mrb[4].mxu1 %vm206_vm1, %v204_v6  ;;  %1035 = vmatprep.subr.bf16.mxu0 %v1078_v4 }
  0x21   :  { %1040 = vmatpush3.bf16.msra.mxu1 %v1039_v10  ;;  %993 = vmatprep.mubr.msk.f32.mxu1 %vm1079_vm0, %v1080_v12  ;;  %v88_v12 = vrot.slane %v66_v26, %v57_v22 }
  0x22   :  { %1041 = vmatprep.subr.bf16.mxu1 %v1078_v4  ;;  %v74_v4 = vrot.slane %v58_v25, %v57_v22 }
  0x23   :  { %1037 = vmatpush3.bf16.msra.mxu0 %v1036_v15  ;;  %v107_v30 = vrot.slane %v88_v12, %v102_v27  ;;  %v98_v39 = vcombine.high %v88_v12, %v88_v12 }
  0x24   :  { %v103_v28 = vrot.slane %v74_v4, %v102_v27  ;;  %v96_v35 = vcombine.high %v74_v4, %v74_v4 }
  0x25   :  { %1043 = vmatpush3.bf16.msra.mxu1 %v1042_v17  ;;  %v115_v42 = vrot.slane %v98_v39, %v102_v27 }
  0x26   :  { %983 = vmatmul.mubr.msk.f32.vlgmr.msra.gmra.mrb[6].mxu0 %vm206_vm1, %v201_v16  ;;  %v111_v41 = vrot.slane %v96_v35, %v102_v27 }
  0x28   :  { %994 = vmatmul.mubr.msk.f32.vlgmr.msra.gmra.mrb[6].mxu1 %vm206_vm1, %v205_v18 }
  0xe1   :  { %v276_v32 = vpop.f32.mrb[0].mxu0 }
  0xe2   :  { %v277_v33 = vadd.f32 %v276_v32, %v103_v28  ;;  %v918_v34 = vpop.f32.mrb[1].mxu0 }
  0xe3   :  { %v349_v36 = vpop.f32.mrb[0].mxu1 }
  0xe4   :  { %v350_v37 = vadd.f32 %v349_v36, %v107_v30  ;;  %v929_v38 = vpop.f32.mrb[1].mxu1 }
  0xe9   :  { %v422_v44 = vpop.f32.mrb[2].mxu0 }
  0xea   :  { %v423_v45 = vadd.f32 %v422_v44, %v111_v41  ;;  %v940_v46 = vpop.f32.mrb[3].mxu0 }
  0xeb   :  { %v495_v47 = vpop.f32.mrb[2].mxu1 }
  0xec   :  { %v791_v48 = vcombine.low %v277_v33, %v423_v45  ;;  %v496_v49 = vadd.f32 %v495_v47, %v115_v42  ;;  %v951_v50 = vpop.f32.mrb[3].mxu1 }
  0xee   :  { %v799_v52 = vcombine.low %v350_v37, %v496_v49  ;;  %v798_v54 = vrot.slane %v791_v48, %v1148_v23 }
  0xf0   :  { %v806_v55 = vrot.slane %v799_v52, %v1148_v23 }
  0xf1   :  { %v568_v57 = vpop.f32.mrb[4].mxu0 }
  0xf2   :  { %v823_v58 = vcombine.low %v798_v54, %v806_v55  ;;  %v569_v59 = vadd.f32 %v568_v57, %v119_v53  ;;  %v962_v60 = vpop.f32.mrb[5].mxu0 }
  0xf3   :  { %v641_v62 = vpop.f32.mrb[4].mxu1 }
  0xf4   :  { %v642_v63 = vadd.f32 %v641_v62, %v123_v56  ;;  %v973_v0 = vpop.f32.mrb[5].mxu1  ;;  %v830_v18 = vrot.slane %v823_v58, %v1160_v29 }
  0xf9   :  { %v714_v5 = vpop.f32.mrb[6].mxu0 }
  0xfa   :  { %v715_v6 = vadd.f32 %v714_v5, %v127_v2  ;;  %v984_v7 = vpop.f32.mrb[7].mxu0 }
  0xfb   :  { %v787_v8 = vpop.f32.mrb[6].mxu1 }
  0xfc   :  { %v807_v9 = vcombine.low %v569_v59, %v715_v6  ;;  %v788_v10 = vadd.f32 %v787_v8, %v131_v3  ;;  %v995_v11 = vpop.f32.mrb[7].mxu1 }
  0xfe   :  { %v815_v14 = vcombine.low %v642_v63, %v788_v10  ;;  %v814_v15 = vrot.slane %v807_v9, %v1148_v23 }
 0x100   :  { %v822_v16 = vrot.slane %v815_v14, %v1148_v23 }
 0x102   :  { %v831_v17 = vcombine.low %v814_v15, %v822_v16 }
 0x104   :  { %v838_v19 = vrot.slane %v831_v17, %v1160_v29 }
 0x106   :  { %v839_v20 = vcombine.low %v830_v18, %v838_v19  ;;  %v840_v21 = vcombine.high %v830_v18, %v838_v19 }
 0x108   :  { %842 = vst.msk [vmem:[#allocation2] sm:$0xff] %vm841_vm2, %v839_v20  ;;  %843 = vst.msk [vmem:[#allocation2 + $0x8] sm:$0xff] %vm841_vm2, %v840_v21 }
 0x109   :  { %1065 = shalt.err (!%p1062_p4)
}
 0x10a   :  { %s1066_s29 = scalar_lea.hbm %s1297_s3, 256 }
 0x10b   :  { %p1067_p5 = scmp.ne.s32.totalorder %s1297_s3, %s1066_s29  ;;  %p1070_p6 = scmp.lt.u32.totalorder %s1066_s29, %s1297_s3 }
 0x10d   :  { %p1072_p7 = pnand %p1070_p6, %p1067_p5 }
 0x10f   :  { %1075 = shalt.err (!%p1072_p7)
}
 0x110   :  { %s1085_s7 = smov 128   ;;  %s1086_s8 = smov 8  }
 0x111   :  { %855 = dma.vmem_to_hbm [thread:$0]  %s850_s25, 256, %s1297_s3, [#allocation3], %s1085_s7, %s1085_s7, %s1086_s8  }
 0x112   :  { %1076 = dma.done.wait [#allocation3], 256  }
 0x113   :  { %1077 = vsyncadd [#allocation3], 4294967040 }
 0x114   :  { %859 = vsyncpa [#allocation3], 1 }

// kernel: tpu_custom_call.1
= control target key start
LH: loop header
LB: loop body
LE: loop exit
PB: predicated region body
PF: predicated region fallthrough
CT: control target
= control target key end

     0   :  { %v53_v3 = vlaneseq  ;;  %v1078_v4 = vmov 0.0|0.0   ;;  %vm1079_vm0 = vmmov 0   ;;  %v1080_v12 = vmov 0.0   ;;  %s1294_s0 = inlined_call_operand.vmem [shape: f32[2,8,32], index: 0, kind: input, shape index: {}]   ;;  %s1295_s1 = inlined_call_operand.vmem [shape: f32[8,32,16], index: 1, kind: input, shape index: {}]   ;;  %s1296_s2 = inlined_call_operand.vmem [shape: f32[8,16], index: 2, kind: input, shape index: {}]   ;;  %s1297_s3 = inlined_call_operand.hbm [shape: f32[2,8,16], index: 3, kind: output, shape index: {}]  }
   0x1   :  { %v17_v0 = vld [vmem:[%s1295_s1] sm:$0xff]  ;;  %v18_v1 = vld [vmem:[%s1295_s1 + $0x8] sm:$0xff]  ;;  %996 = vmatprep.subr.bf16.mxu0 %v1078_v4  ;;  %1002 = vmatprep.subr.bf16.mxu1 %v1078_v4  ;;  %v19_v7 = vld [vmem:[%s1295_s1 + $0x10] sm:$0xff]  ;;  %v1081_v13 = vmov 1983009808   ;;  %vm206_vm1 = vcmask 261120  }
   0x2   :  { %v21_v2 = vld [vmem:[%s1295_s1 + $0x20] sm:$0xff]  ;;  %v997_v5 = vpack.c.bf16 %v18_v1, %v17_v0  ;;  %v22_v6 = vld [vmem:[%s1295_s1 + $0x28] sm:$0xff]  ;;  %v20_v8 = vld [vmem:[%s1295_s1 + $0x18] sm:$0xff]  ;;  %916 = vmatprep.mubr.msk.f32.mxu0 %vm1079_vm0, %v1080_v12  ;;  %v51_v14 = vunpack.c.l.s4 %v1081_v13  ;;  %v1135_v15 = vshrl.u32 %v53_v3, 7  ;;  %927 = vmatprep.mubr.msk.f32.mxu1 %vm1079_vm0, %v1080_v12  ;;  %v1082_v19 = vmov 1934713408  }
   0x3   :  { %v1003_v9 = vpack.c.bf16 %v22_v6, %v21_v2  ;;  %v23_v10 = vld [vmem:[%s1295_s1 + $0x30] sm:$0xff]  ;;  %v24_v11 = vld [vmem:[%s1295_s1 + $0x38] sm:$0xff]  ;;  %v1000_v16 = vpack.c.bf16 %v20_v8, %v19_v7  ;;  %v82_v20 = vunpack.c.l.s4 %v1082_v19  ;;  %v15_v21 = vld [vmem:[%s1294_s0] sm:$0xff] }
   0x4   :  { %998 = vmatpush3.bf16.msra.mxu0 %v997_v5  ;;  %v1006_v17 = vpack.c.bf16 %v24_v11, %v23_v10  ;;  %v52_v18 = vunpack.c.0.s8 %v51_v14  ;;  %v16_v22 = vld [vmem:[%s1294_s0 + $0x8] sm:$0xff]  ;;  %v25_v27 = vld [vmem:[%s1295_s1 + $0x40] sm:$0xff] }
   0x5   :  { %1004 = vmatpush3.bf16.msra.mxu1 %v1003_v9  ;;  %999 = vmatprep.subr.bf16.mxu0 %v1078_v4  ;;  %v83_v24 = vunpack.c.0.s8 %v82_v20  ;;  %v26_v28 = vld [vmem:[%s1295_s1 + $0x48] sm:$0xff]  ;;  %v29_v31 = vld [vmem:[%s1295_s1 + $0x60] sm:$0xff] }
   0x6   :  { %1005 = vmatprep.subr.bf16.mxu1 %v1078_v4  ;;  %v1148_v23 = vsub.s32 %v52_v18, %v1135_v15  ;;  %v30_v32 = vld [vmem:[%s1295_s1 + $0x68] sm:$0xff]  ;;  %v1009_v33 = vpack.c.bf16 %v26_v28, %v25_v27 }
   0x7   :  { %v1160_v29 = vsub.s32 %v83_v24, %v1135_v15 }
   0x8   :  { %1001 = vmatpush3.bf16.msra.mxu0 %v1000_v16  ;;  %v56_v25 = vrot.slane %v15_v21, %v1148_v23  ;;  %v71_v26 = vrot.slane %v16_v22, %v1148_v23 }
   0x9   :  { %1007 = vmatpush3.bf16.msra.mxu1 %v1006_v17  ;;  %1008 = vmatprep.subr.bf16.mxu0 %v1078_v4 }
   0xa   :  { %1014 = vmatprep.subr.bf16.mxu1 %v1078_v4  ;;  %v79_v30 = vcombine.low %v56_v25, %v71_v26 }
   0xb   :  { %8 = vsyncpa [#allocation3], 0  ;;  %v49_v34 = vcombine.high %v15_v21, %v1080_v12  ;;  %v64_v35 = vcombine.high %v16_v22, %v1080_v12  ;;  %v80_v36 = vcombine.high %v56_v25, %v71_v26  ;;  %v27_v38 = vld [vmem:[%s1295_s1 + $0x50] sm:$0xff]  ;;  %v28_v39 = vld [vmem:[%s1295_s1 + $0x58] sm:$0xff]  ;;  %v1015_v40 = vpack.c.bf16 %v30_v32, %v29_v31 }
   0xc   :  { %v87_v37 = vrot.slane %v79_v30, %v1160_v29  ;;  %v31_v42 = vld [vmem:[%s1295_s1 + $0x70] sm:$0xff]  ;;  %v32_v43 = vld [vmem:[%s1295_s1 + $0x78] sm:$0xff]  ;;  %v1012_v44 = vpack.c.bf16 %v28_v39, %v27_v38  ;;  %v33_v48 = vld [vmem:[%s1295_s1 + $0x80] sm:$0xff]  ;;  %v1083_v19 = vmov 1966171168   ;;  %v168_v27 = vsub.s32 0, %v1135_v15 }
   0xd   :  { %v63_v45 = vrot.slane %v49_v34, %v1148_v23  ;;  %v78_v46 = vrot.slane %v64_v35, %v1148_v23  ;;  %v94_v47 = vrot.slane %v80_v36, %v1160_v29  ;;  %v34_v49 = vld [vmem:[%s1295_s1 + $0x88] sm:$0xff]  ;;  %v1018_v50 = vpack.c.bf16 %v32_v43, %v31_v42  ;;  %v37_v51 = vld [vmem:[%s1295_s1 + $0xa0] sm:$0xff]  ;;  %v35_v55 = vld [vmem:[%s1295_s1 + $0x90] sm:$0xff] }
   0xe   :  { %917 = vmatmul.mubr.msk.f32.vlgmr.msra.gmra.mrb[0].mxu0 %vm206_vm1, %v87_v37  ;;  %v111_v41 = vcombine.high %v87_v37, %v1080_v12  ;;  %v38_v52 = vld [vmem:[%s1295_s1 + $0xa8] sm:$0xff]  ;;  %v1021_v53 = vpack.c.bf16 %v34_v49, %v33_v48  ;;  %v36_v56 = vld [vmem:[%s1295_s1 + $0x98] sm:$0xff]  ;;  %v39_v59 = vld [vmem:[%s1295_s1 + $0xb0] sm:$0xff]  ;;  %v119_v20 = vunpack.c.l.s4 %v1083_v19  ;;  %vm841_vm2 = vcmask 130048  }
   0xf   :  { %1010 = vmatpush3.bf16.msra.mxu0 %v1009_v33  ;;  %938 = vmatprep.mubr.msk.f32.mxu0 %vm1079_vm0, %v1080_v12  ;;  %v112_v54 = vcombine.high %v94_v47, %v1080_v12  ;;  %v95_v57 = vcombine.low %v63_v45, %v78_v46  ;;  %v1027_v58 = vpack.c.bf16 %v38_v52, %v37_v51  ;;  %v40_v60 = vld [vmem:[%s1295_s1 + $0xb8] sm:$0xff]  ;;  %v41_v63 = vld [vmem:[%s1295_s1 + $0xc0] sm:$0xff]  ;;  %v42_v0 = vld [vmem:[%s1295_s1 + $0xc8] sm:$0xff] }
  0x10   :  { %928 = vmatmul.mubr.msk.f32.vlgmr.msra.gmra.mrb[0].mxu1 %vm206_vm1, %v111_v41  ;;  %1011 = vmatprep.subr.bf16.mxu0 %v1078_v4  ;;  %v1024_v61 = vpack.c.bf16 %v36_v56, %v35_v55  ;;  %v1030_v1 = vpack.c.bf16 %v40_v60, %v39_v59  ;;  %v45_v2 = vld [vmem:[%s1295_s1 + $0xe0] sm:$0xff]  ;;  %v46_v3 = vld [vmem:[%s1295_s1 + $0xe8] sm:$0xff]  ;;  %v1033_v5 = vpack.c.bf16 %v42_v0, %v41_v63  ;;  %v43_v7 = vld [vmem:[%s1295_s1 + $0xd0] sm:$0xff]  ;;  %v120_v21 = vunpack.c.0.s8 %v119_v20 }
  0x11   :  { %1016 = vmatpush3.bf16.msra.mxu1 %v1015_v40  ;;  %949 = vmatprep.mubr.msk.f32.mxu1 %vm1079_vm0, %v1080_v12  ;;  %v103_v62 = vrot.slane %v95_v57, %v1160_v29  ;;  %v44_v8 = vld [vmem:[%s1295_s1 + $0xd8] sm:$0xff]  ;;  %v96_v9 = vcombine.high %v63_v45, %v78_v46  ;;  %v1039_v10 = vpack.c.bf16 %v46_v3, %v45_v2  ;;  %v47_v11 = vld [vmem:[%s1295_s1 + $0xf0] sm:$0xff]  ;;  %v115_v24 = vld [vmem:[%s1296_s2] sm:$0xff]  ;;  %s1084_s2 = smov [#allocation2]  }
  0x12   :  { %1017 = vmatprep.subr.bf16.mxu1 %v1078_v4  ;;  %v48_v13 = vld [vmem:[%s1295_s1 + $0xf8] sm:$0xff]  ;;  %v1036_v14 = vpack.c.bf16 %v44_v8, %v43_v7  ;;  %v123_v22 = vsub.s32 %v120_v21, %v1135_v15  ;;  %v117_v31 = vcombine.high %v115_v24, %v115_v24  ;;  %s849_s25 = sshll.u32 %s1084_s2, 4  ;;  %s850_s25 = int_to_ptr.vmem [resolvable:$true] %s849_s25 }
  0x13   :  { %1013 = vmatpush3.bf16.msra.mxu0 %v1012_v44  ;;  %v113_v6 = vcombine.high %v103_v62, %v1080_v12  ;;  %v110_v16 = vrot.slane %v96_v9, %v1160_v29  ;;  %v1042_v17 = vpack.c.bf16 %v48_v13, %v47_v11  ;;  %s1054_s26 = scalar_lea.vmem %s850_s25, 256  ;;  %p1059_p1 = scmp.lt.s32.totalorder %s850_s25, %s850_s25 }
  0x14   :  { %1020 = vmatprep.subr.bf16.mxu0 %v1078_v4  ;;  %v124_v25 = vrot.slane %v115_v24, %v123_v22  ;;  %v131_v40 = vrot.slane %v117_v31, %v123_v22  ;;  %p1055_p0 = scmp.ne.s32.totalorder %s850_s25, %s1054_s26  ;;  %p1060_p2 = scmp.lt.s32.totalorder %s1054_s26, %s1054_s26 }
  0x15   :  { %1019 = vmatpush3.bf16.msra.mxu1 %v1018_v50  ;;  %v114_v18 = vcombine.high %v110_v16, %v1080_v12 }
  0x16   :  { %939 = vmatmul.mubr.msk.f32.vlgmr.msra.gmra.mrb[2].mxu0 %vm206_vm1, %v94_v47  ;;  %1026 = vmatprep.subr.bf16.mxu1 %v1078_v4  ;;  %v132_v26 = vcombine.high %v124_v25, %v124_v25  ;;  %v133_v43 = vcombine.high %v131_v40, %v131_v40  ;;  %v147_v15 = vrot.slane %v131_v40, %v123_v22  ;;  %p1061_p3 = por %p1060_p2, %p1059_p1 }
  0x17   :  { %1022 = vmatpush3.bf16.msra.mxu0 %v1021_v53  ;;  %960 = vmatprep.mubr.msk.f32.mxu0 %vm1079_vm0, %v1080_v12 }
  0x18   :  { %950 = vmatmul.mubr.msk.f32.vlgmr.msra.gmra.mrb[2].mxu1 %vm206_vm1, %v112_v54  ;;  %1023 = vmatprep.subr.bf16.mxu0 %v1078_v4  ;;  %v161_v51 = vrot.slane %v133_v43, %v123_v22  ;;  %v185_v53 = vrot.slane %v147_v15, %v168_v27  ;;  %p1062_p4 = pnand %p1061_p3, %p1055_p0 }
  0x19   :  { %1028 = vmatpush3.bf16.msra.mxu1 %v1027_v58  ;;  %971 = vmatprep.mubr.msk.f32.mxu1 %vm1079_vm0, %v1080_v12 }
  0x1a   :  { %1029 = vmatprep.subr.bf16.mxu1 %v1078_v4  ;;  %v189_v56 = vrot.slane %v161_v51, %v168_v27 }
  0x1b   :  { %1025 = vmatpush3.bf16.msra.mxu0 %v1024_v61  ;;  %v163_v61 = vcombine.high %v147_v15, %v147_v15 }
  0x1c   :  { %1032 = vmatprep.subr.bf16.mxu0 %v1078_v4 }
  0x1d   :  { %1031 = vmatpush3.bf16.msra.mxu1 %v1030_v1  ;;  %v165_v1 = vcombine.high %v161_v51, %v161_v51  ;;  %v193_v2 = vrot.slane %v163_v61, %v168_v27 }
  0x1e   :  { %961 = vmatmul.mubr.msk.f32.vlgmr.msra.gmra.mrb[4].mxu0 %vm206_vm1, %v103_v62  ;;  %1038 = vmatprep.subr.bf16.mxu1 %v1078_v4 }
  0x1f   :  { %1034 = vmatpush3.bf16.msra.mxu0 %v1033_v5  ;;  %982 = vmatprep.mubr.msk.f32.mxu0 %vm1079_vm0, %v1080_v12  ;;  %v197_v3 = vrot.slane %v165_v1, %v168_v27 }
  0x20   :  { %972 = vmatmul.mubr.msk.f32.vlgmr.msra.gmra.mrb[4].mxu1 %vm206_vm1, %v113_v6  ;;  %1035 = vmatprep.subr.bf16.mxu0 %v1078_v4 }
  0x21   :  { %1040 = vmatpush3.bf16.msra.mxu1 %v1039_v10  ;;  %993 = vmatprep.mubr.msk.f32.mxu1 %vm1079_vm0, %v1080_v12  ;;  %v154_v12 = vrot.slane %v132_v26, %v123_v22 }
  0x22   :  { %1041 = vmatprep.subr.bf16.mxu1 %v1078_v4  ;;  %v140_v4 = vrot.slane %v124_v25, %v123_v22 }
  0x23   :  { %1037 = vmatpush3.bf16.msra.mxu0 %v1036_v14  ;;  %v173_v30 = vrot.slane %v154_v12, %v168_v27  ;;  %v164_v39 = vcombine.high %v154_v12, %v154_v12 }
  0x24   :  { %v169_v28 = vrot.slane %v140_v4, %v168_v27  ;;  %v162_v35 = vcombine.high %v140_v4, %v140_v4 }
  0x25   :  { %1043 = vmatpush3.bf16.msra.mxu1 %v1042_v17  ;;  %v181_v42 = vrot.slane %v164_v39, %v168_v27 }
  0x26   :  { %983 = vmatmul.mubr.msk.f32.vlgmr.msra.gmra.mrb[6].mxu0 %vm206_vm1, %v110_v16  ;;  %v177_v41 = vrot.slane %v162_v35, %v168_v27 }
  0x28   :  { %994 = vmatmul.mubr.msk.f32.vlgmr.msra.gmra.mrb[6].mxu1 %vm206_vm1, %v114_v18 }
  0xe1   :  { %v276_v32 = vpop.f32.mrb[0].mxu0 }
  0xe2   :  { %v277_v33 = vadd.f32 %v276_v32, %v169_v28  ;;  %v918_v34 = vpop.f32.mrb[1].mxu0 }
  0xe3   :  { %v349_v36 = vpop.f32.mrb[0].mxu1 }
  0xe4   :  { %v350_v37 = vadd.f32 %v349_v36, %v173_v30  ;;  %v929_v38 = vpop.f32.mrb[1].mxu1 }
  0xe9   :  { %v422_v44 = vpop.f32.mrb[2].mxu0 }
  0xea   :  { %v423_v45 = vadd.f32 %v422_v44, %v177_v41  ;;  %v940_v46 = vpop.f32.mrb[3].mxu0 }
  0xeb   :  { %v495_v47 = vpop.f32.mrb[2].mxu1 }
  0xec   :  { %v791_v48 = vcombine.low %v277_v33, %v423_v45  ;;  %v496_v49 = vadd.f32 %v495_v47, %v181_v42  ;;  %v951_v50 = vpop.f32.mrb[3].mxu1 }
  0xee   :  { %v799_v52 = vcombine.low %v350_v37, %v496_v49  ;;  %v798_v54 = vrot.slane %v791_v48, %v1148_v23 }
  0xf0   :  { %v806_v55 = vrot.slane %v799_v52, %v1148_v23 }
  0xf1   :  { %v568_v57 = vpop.f32.mrb[4].mxu0 }
  0xf2   :  { %v823_v58 = vcombine.low %v798_v54, %v806_v55  ;;  %v569_v59 = vadd.f32 %v568_v57, %v185_v53  ;;  %v962_v60 = vpop.f32.mrb[5].mxu0 }
  0xf3   :  { %v641_v62 = vpop.f32.mrb[4].mxu1 }
  0xf4   :  { %v642_v63 = vadd.f32 %v641_v62, %v189_v56  ;;  %v973_v0 = vpop.f32.mrb[5].mxu1  ;;  %v830_v18 = vrot.slane %v823_v58, %v1160_v29 }
  0xf9   :  { %v714_v5 = vpop.f32.mrb[6].mxu0 }
  0xfa   :  { %v715_v6 = vadd.f32 %v714_v5, %v193_v2  ;;  %v984_v7 = vpop.f32.mrb[7].mxu0 }
  0xfb   :  { %v787_v8 = vpop.f32.mrb[6].mxu1 }
  0xfc   :  { %v807_v9 = vcombine.low %v569_v59, %v715_v6  ;;  %v788_v10 = vadd.f32 %v787_v8, %v197_v3  ;;  %v995_v11 = vpop.f32.mrb[7].mxu1 }
  0xfe   :  { %v815_v13 = vcombine.low %v642_v63, %v788_v10  ;;  %v814_v14 = vrot.slane %v807_v9, %v1148_v23 }
 0x100   :  { %v822_v16 = vrot.slane %v815_v13, %v1148_v23 }
 0x102   :  { %v831_v17 = vcombine.low %v814_v14, %v822_v16 }
 0x104   :  { %v838_v19 = vrot.slane %v831_v17, %v1160_v29 }
 0x106   :  { %v839_v20 = vcombine.low %v830_v18, %v838_v19  ;;  %v840_v21 = vcombine.high %v830_v18, %v838_v19 }
 0x108   :  { %842 = vst.msk [vmem:[#allocation2] sm:$0xff] %vm841_vm2, %v839_v20  ;;  %843 = vst.msk [vmem:[#allocation2 + $0x8] sm:$0xff] %vm841_vm2, %v840_v21 }
 0x109   :  { %1065 = shalt.err (!%p1062_p4)
}
 0x10a   :  { %s1066_s29 = scalar_lea.hbm %s1297_s3, 256 }
 0x10b   :  { %p1067_p5 = scmp.ne.s32.totalorder %s1297_s3, %s1066_s29  ;;  %p1070_p6 = scmp.lt.u32.totalorder %s1066_s29, %s1297_s3 }
 0x10d   :  { %p1072_p7 = pnand %p1070_p6, %p1067_p5 }
 0x10f   :  { %1075 = shalt.err (!%p1072_p7)
}
 0x110   :  { %s1085_s7 = smov 128   ;;  %s1086_s8 = smov 8  }
 0x111   :  { %855 = dma.vmem_to_hbm [thread:$0]  %s850_s25, 256, %s1297_s3, [#allocation3], %s1085_s7, %s1085_s7, %s1086_s8  }
 0x112   :  { %1076 = dma.done.wait [#allocation3], 256  }
 0x113   :  { %1077 = vsyncadd [#allocation3], 4294967040 }
 0x114   :  { %859 = vsyncpa [#allocation3], 1 }

</bundles_post_ra>
